<compile_context>
chip_gen: v7x
topology: tpu7x:2x2x1
jax: 0.10.0
libtpu: 0.0.40
codegen_flags: <defaults>
</compile_context>

<pallas_src>
import jax
import jax.numpy as jnp
from jax.experimental import pallas as pl
from jax.experimental.pallas import tpu as pltpu


def temporal_adapter_kernel(x_ref, waug_ref, bup_ref, wdn_ref, bdn_ref, o_ref):
    # x_ref:    (TB, T, TN)  current (batch-tile, token-tile) slab; N on lanes.
    # waug_ref: (H+1, T)     up_project weight + appended (1/T)*ones row.
    # bup_ref:  (H+1, 1)     up_project bias (0 for the mean row), f32.
    # wdn_ref:  (1, H)       down_project weight, f32.
    # bdn_ref:  (1,)         down_project bias scalar, SMEM, f32.
    # o_ref:    (TB, TN)
    tb = x_ref.shape[0]
    h = wdn_ref.shape[1]

    waug = waug_ref[...]        # (H+1, T)  in x's dtype
    bup = bup_ref[...]          # (H+1, 1)  f32
    wdn = wdn_ref[...]          # (1, H)    f32
    bdn = bdn_ref[0]            # scalar    f32

    # Static unroll over the small batch tile: keeps N on lanes end-to-end and
    # avoids the (h,b,n)->(b,h,n) relayout a batched einsum would introduce.
    for b in range(tb):
        xb = x_ref[b]                                                  # (T, TN)
        up = jnp.dot(waug, xb,
                     preferred_element_type=jnp.float32) + bup         # (H+1, TN)
        act = jnp.maximum(up[:h, :], 0.0)                              # (H, TN)
        mean_x = up[h:h + 1, :]                                        # (1, TN)
        down = jnp.dot(wdn, act, preferred_element_type=jnp.float32)   # (1, TN)
        o_ref[pl.ds(b, 1), :] = (down + mean_x + bdn).astype(o_ref.dtype)


def _pick_token_tile(n, max_lanes):
    """Largest multiple of 128 that divides n and is <= max_lanes (clamped to
    >=128); if n is not 128-aligned, use the full axis (legal: equals dim)."""
    if n % 128 != 0:
        return n
    tn = min(n, max(128, max_lanes))
    tn -= tn % 128
    tn = max(tn, 128)
    while n % tn != 0:
        tn -= 128
    return tn


def _per_lane_bytes(T, H, x_isz, out_isz):
    # Conservative per-lane, per-batch-row VMEM footprint: double-buffered x
    # and out blocks plus f32 intermediates (up incl. mean row, act), assuming
    # no buffer reuse.
    return 2 * T * x_isz + 2 * out_isz + (2 * H + 8) * 4 + 16


def _choose_tiles(B, T, N, H, x_isz, out_isz, *, vmem_budget, target_x_bytes,
                  tb_cap=16):
    per_lane = _per_lane_bytes(T, H, x_isz, out_isz)
    divisors = [d for d in range(1, min(B, tb_cap) + 1) if B % d == 0]
    best = (1, _pick_token_tile(N, max(128, vmem_budget // per_lane)))
    for d in divisors:
        max_lanes = max(128, vmem_budget // (d * per_lane))
        tn_d = _pick_token_tile(N, max_lanes)
        best = (d, tn_d)
        # Stop once each step moves enough x bytes and stores are sublane-dense.
        if d >= min(8, B) and d * T * tn_d * x_isz >= target_x_bytes:
            break
    tb, tn = best
    # Keep >= 2 grid steps when the shape allows: v7x gets both TensorCores
    # busy, and all generations keep DMA/compute overlapped in the pipeline.
    if (B // tb) * (N // tn) < 2 and N % 256 == 0:
        tn = _pick_token_tile(N, max(128, tn // 2))
    return tb, tn


def temporal_adapter(x, w_up, b_up, w_down, b_down, *, block_b=None, block_n=None):
    """x: (B, T, N); w_up: (H, T); b_up: (H,); w_down: (1, H); b_down: (1,).
    Returns (B, N) in x's dtype."""
    B, T, N = x.shape
    H = w_up.shape[0]
    out_dtype = x.dtype
    x_isz = jnp.dtype(x.dtype).itemsize
    out_isz = jnp.dtype(out_dtype).itemsize

    vmem_budget = 18 * 1024 * 1024      # sized against v5e/v7x scoped limits
    target_x_bytes = 2 * 1024 * 1024    # aim for ~2 MiB of x per grid step

    tb_auto, tn_auto = _choose_tiles(B, T, N, H, x_isz, out_isz,
                                     vmem_budget=vmem_budget,
                                     target_x_bytes=target_x_bytes)
    tb = block_b if block_b is not None else tb_auto
    tn = block_n if block_n is not None else tn_auto
    assert B % tb == 0 and N % tn == 0, (tb, tn)

    # Fuse the temporal mean into the up projection (extra (1/T)*ones row).
    ones_row = jnp.full((1, T), 1.0 / T, dtype=jnp.float32)
    waug = jnp.concatenate([w_up.astype(jnp.float32), ones_row], axis=0)
    waug = waug.astype(x.dtype)                                      # (H+1, T)
    baug = jnp.concatenate([b_up.astype(jnp.float32),
                            jnp.zeros((1,), jnp.float32)]).reshape(H + 1, 1)
    wdn = w_down.astype(jnp.float32)                                 # (1, H)
    bdn = b_down.reshape(1).astype(jnp.float32)                      # SMEM scalar

    per_lane = _per_lane_bytes(T, H, x_isz, out_isz)
    vmem_limit = int(min(max(32 * 1024 * 1024, tb * tn * per_lane + (4 << 20)),
                         56 * 1024 * 1024))

    grid = (B // tb, N // tn)
    return pl.pallas_call(
        temporal_adapter_kernel,
        out_shape=jax.ShapeDtypeStruct((B, N), out_dtype),
        grid_spec=pltpu.PrefetchScalarGridSpec(
            num_scalar_prefetch=0,
            grid=grid,
            in_specs=[
                pl.BlockSpec((tb, T, tn), lambda b, n: (b, 0, n)),
                pl.BlockSpec((H + 1, T), lambda b, n: (0, 0)),
                pl.BlockSpec((H + 1, 1), lambda b, n: (0, 0)),
                pl.BlockSpec((1, H), lambda b, n: (0, 0)),
                pl.BlockSpec(memory_space=pltpu.MemorySpace.SMEM),
            ],
            out_specs=pl.BlockSpec((tb, tn), lambda b, n: (b, n)),
        ),
        compiler_params=pltpu.CompilerParams(
            dimension_semantics=("parallel", "parallel"),
            vmem_limit_bytes=vmem_limit),
    )(x, waug, baug, wdn, bdn)


def temporal_adapter_ref(x, w_up, b_up, w_down, b_down):
    mean_x = x.mean(axis=1)                                 # (B, N)
    xt = jnp.swapaxes(x, 1, 2)                              # (B, N, T)
    up = jnp.einsum("bnt,ht->bnh", xt, w_up) + b_up         # (B, N, H)
    act = jnp.maximum(up, 0.0)
    down = jnp.einsum("bnh,oh->bno", act, w_down) + b_down  # (B, N, 1)
    return down[..., 0] + mean_x


if __name__ == "__main__":
    def run_case(B, T, N, H, dtype=jnp.float32, block_b=None, block_n=None,
                 atol=1e-5, rtol=1e-5, zero_atol=1e-6):
        key = jax.random.PRNGKey(0)
        kx, kw1, kb1, kw2, kb2 = jax.random.split(key, 5)
        x = jax.random.normal(kx, (B, T, N), dtype=jnp.float32).astype(dtype)

        # NOTE: the PyTorch module zero-initializes the adapter params (output
        # == mean_x).  Small random params here exercise the matmul/relu path;
        # the zero-init case is checked separately below.
        w_up = 0.1 * jax.random.normal(kw1, (H, T), dtype=jnp.float32)
        b_up = 0.1 * jax.random.normal(kb1, (H,), dtype=jnp.float32)
        w_down = 0.1 * jax.random.normal(kw2, (1, H), dtype=jnp.float32)
        b_down = 0.1 * jax.random.normal(kb2, (1,), dtype=jnp.float32)

        out = jax.block_until_ready(
            temporal_adapter(x, w_up, b_up, w_down, b_down,
                             block_b=block_b, block_n=block_n))
        ref = temporal_adapter_ref(x.astype(jnp.float32), w_up, b_up, w_down, b_down)
        assert out.shape == (B, N) and out.dtype == dtype
        err = jnp.max(jnp.abs(out.astype(jnp.float32) - ref))
        assert jnp.allclose(out.astype(jnp.float32), ref, atol=atol, rtol=rtol), (
            f"max err {err}")

        # Module-default (all-zero adapter) case: output == mean over T.
        z = jnp.zeros_like
        out0 = jax.block_until_ready(
            temporal_adapter(x, z(w_up), z(b_up), z(w_down), z(b_down),
                             block_b=block_b, block_n=block_n))
        mref = x.astype(jnp.float32).mean(axis=1)
        assert jnp.allclose(out0.astype(jnp.float32), mref, atol=zero_atol)

    # Module-implied small shapes: batch=2, temporal=8, tokens=16, hidden=32.
    run_case(B=2, T=8, N=16, H=32)
    # Lane-aligned token tiling: grid (1, 2).
    run_case(B=2, T=8, N=256, H=32, block_n=128)
    # Batch folding with auto tile selection (sublane-dense output block).
    run_case(B=16, T=8, N=1024, H=32)
    # Native-dtype path (no wrapper f32 upcast): bf16 in, bf16 out.
    run_case(B=4, T=8, N=256, H=32, dtype=jnp.bfloat16,
             atol=5e-2, rtol=5e-2, zero_atol=1e-2)

    print("KERNEL_OK")
</pallas_src>

<mosaic_0001>
module attributes {stable_mosaic.version = 11 : i64} {
  func.func @temporal_adapter_kernel(%arg0: i32, %arg1: i32, %arg2: memref<2x8x16xf32, #tpu.memory_space<vmem>>, %arg3: memref<33x8xf32, #tpu.memory_space<vmem>>, %arg4: memref<33x1xf32, #tpu.memory_space<vmem>>, %arg5: memref<1x32xf32, #tpu.memory_space<vmem>>, %arg6: memref<1xf32, #tpu.memory_space<smem>>, %arg7: memref<2x16xf32, #tpu.memory_space<vmem>>) attributes {dimension_semantics = [#tpu.dimension_semantics<parallel>, #tpu.dimension_semantics<parallel>], iteration_bounds = array<i64: 1, 1>, scalar_prefetch = 0 : i64, scratch_operands = 0 : i64, tpu.core_type = #tpu.core_type<tc>, window_params = [{transform_indices = @transform_0, window_bounds = array<i64: 2, 8, 16>}, {pipeline_mode = #tpu.pipeline_mode<synchronous>, transform_indices = @transform_1, window_bounds = array<i64: 33, 8>}, {pipeline_mode = #tpu.pipeline_mode<synchronous>, transform_indices = @transform_2, window_bounds = array<i64: 33, 1>}, {pipeline_mode = #tpu.pipeline_mode<synchronous>, transform_indices = @transform_3, window_bounds = array<i64: 1, 32>}, {transform_indices = @transform_4, window_bounds = array<i64: 1>}, {transform_indices = @transform_5, window_bounds = array<i64: 2, 16>}]} {
    %c0 = arith.constant 0 : index
    %c0_0 = arith.constant 0 : index
    %0 = vector.load %arg3[%c0, %c0_0] : memref<33x8xf32, #tpu.memory_space<vmem>>, vector<33x8xf32>
    %c0_1 = arith.constant 0 : index
    %c0_2 = arith.constant 0 : index
    %1 = vector.load %arg4[%c0_1, %c0_2] : memref<33x1xf32, #tpu.memory_space<vmem>>, vector<33x1xf32>
    %c0_3 = arith.constant 0 : index
    %c0_4 = arith.constant 0 : index
    %2 = vector.load %arg5[%c0_3, %c0_4] : memref<1x32xf32, #tpu.memory_space<vmem>>, vector<1x32xf32>
    %c0_5 = arith.constant 0 : index
    %3 = memref.load %arg6[%c0_5] : memref<1xf32, #tpu.memory_space<smem>>
    %c0_6 = arith.constant 0 : index
    %c0_7 = arith.constant 0 : index
    %c0_8 = arith.constant 0 : index
    %4 = vector.load %arg2[%c0_6, %c0_7, %c0_8] : memref<2x8x16xf32, #tpu.memory_space<vmem>>, vector<1x8x16xf32>
    %5 = vector.shape_cast %4 : vector<1x8x16xf32> to vector<8x16xf32>
    %cst = arith.constant dense<0.000000e+00> : vector<33x16xf32>
    %6 = tpu.matmul %0, %5, %cst {dimension_numbers = #tpu.dot_dimension_numbers<[1], [0], [0], [1], [0, 0, 1, 1], [], []>} : vector<33x8xf32>, vector<8x16xf32>, vector<33x16xf32> -> vector<33x16xf32>
    %7 = vector.broadcast %1 : vector<33x1xf32> to vector<33x16xf32>
    %8 = arith.addf %6, %7 : vector<33x16xf32>
    %9 = vector.extract_strided_slice %8 {offsets = [0, 0], sizes = [32, 16], strides = [1, 1]} : vector<33x16xf32> to vector<32x16xf32>
    %cst_9 = arith.constant 0.000000e+00 : f32
    %10 = vector.broadcast %cst_9 : f32 to vector<32x16xf32>
    %11 = arith.maximumf %9, %10 : vector<32x16xf32>
    %12 = vector.extract_strided_slice %8 {offsets = [32, 0], sizes = [1, 16], strides = [1, 1]} : vector<33x16xf32> to vector<1x16xf32>
    %cst_10 = arith.constant dense<0.000000e+00> : vector<1x16xf32>
    %13 = tpu.matmul %2, %11, %cst_10 {dimension_numbers = #tpu.dot_dimension_numbers<[1], [0], [0], [1], [0, 0, 1, 1], [], []>} : vector<1x32xf32>, vector<32x16xf32>, vector<1x16xf32> -> vector<1x16xf32>
    %14 = arith.addf %13, %12 : vector<1x16xf32>
    %15 = vector.broadcast %3 : f32 to vector<1x16xf32>
    %16 = arith.addf %14, %15 : vector<1x16xf32>
    %c0_11 = arith.constant 0 : index
    %c0_12 = arith.constant 0 : index
    %17 = vector.load %arg7[%c0_11, %c0_12] : memref<2x16xf32, #tpu.memory_space<vmem>>, vector<1x16xf32>
    tpu.vector_store %arg7[%c0_11, %c0_12], %16 {strides = array<i32>} : memref<2x16xf32, #tpu.memory_space<vmem>>, vector<1x16xf32>,
    %c1 = arith.constant 1 : index
    %c0_13 = arith.constant 0 : index
    %c0_14 = arith.constant 0 : index
    %18 = vector.load %arg2[%c1, %c0_13, %c0_14] : memref<2x8x16xf32, #tpu.memory_space<vmem>>, vector<1x8x16xf32>
    %19 = vector.shape_cast %18 : vector<1x8x16xf32> to vector<8x16xf32>
    %cst_15 = arith.constant dense<0.000000e+00> : vector<33x16xf32>
    %20 = tpu.matmul %0, %19, %cst_15 {dimension_numbers = #tpu.dot_dimension_numbers<[1], [0], [0], [1], [0, 0, 1, 1], [], []>} : vector<33x8xf32>, vector<8x16xf32>, vector<33x16xf32> -> vector<33x16xf32>
    %21 = vector.broadcast %1 : vector<33x1xf32> to vector<33x16xf32>
    %22 = arith.addf %20, %21 : vector<33x16xf32>
    %23 = vector.extract_strided_slice %22 {offsets = [0, 0], sizes = [32, 16], strides = [1, 1]} : vector<33x16xf32> to vector<32x16xf32>
    %cst_16 = arith.constant 0.000000e+00 : f32
    %24 = vector.broadcast %cst_16 : f32 to vector<32x16xf32>
    %25 = arith.maximumf %23, %24 : vector<32x16xf32>
    %26 = vector.extract_strided_slice %22 {offsets = [32, 0], sizes = [1, 16], strides = [1, 1]} : vector<33x16xf32> to vector<1x16xf32>
    %cst_17 = arith.constant dense<0.000000e+00> : vector<1x16xf32>
    %27 = tpu.matmul %2, %25, %cst_17 {dimension_numbers = #tpu.dot_dimension_numbers<[1], [0], [0], [1], [0, 0, 1, 1], [], []>} : vector<1x32xf32>, vector<32x16xf32>, vector<1x16xf32> -> vector<1x16xf32>
    %28 = arith.addf %27, %26 : vector<1x16xf32>
    %29 = vector.broadcast %3 : f32 to vector<1x16xf32>
    %30 = arith.addf %28, %29 : vector<1x16xf32>
    %c1_18 = arith.constant 1 : index
    %c0_19 = arith.constant 0 : index
    %31 = vector.load %arg7[%c1_18, %c0_19] : memref<2x16xf32, #tpu.memory_space<vmem>>, vector<1x16xf32>
    tpu.vector_store %arg7[%c1_18, %c0_19], %30 {strides = array<i32>} : memref<2x16xf32, #tpu.memory_space<vmem>>, vector<1x16xf32>,
    return
  }
  func.func @transform_0(%arg0: i32, %arg1: i32) -> (i32, i32, i32) {
    %c0_i32 = arith.constant 0 : i32
    %c0_i32_0 = arith.constant 0 : i32
    return %arg0, %c0_i32, %arg1 : i32, i32, i32
  }
  func.func @transform_1(%arg0: i32, %arg1: i32) -> (i32, i32) {
    %c0_i32 = arith.constant 0 : i32
    %c0_i32_0 = arith.constant 0 : i32
    %c0_i32_1 = arith.constant 0 : i32
    return %c0_i32, %c0_i32_0 : i32, i32
  }
  func.func @transform_2(%arg0: i32, %arg1: i32) -> (i32, i32) {
    %c0_i32 = arith.constant 0 : i32
    %c0_i32_0 = arith.constant 0 : i32
    %c0_i32_1 = arith.constant 0 : i32
    return %c0_i32, %c0_i32_0 : i32, i32
  }
  func.func @transform_3(%arg0: i32, %arg1: i32) -> (i32, i32) {
    %c0_i32 = arith.constant 0 : i32
    %c0_i32_0 = arith.constant 0 : i32
    %c0_i32_1 = arith.constant 0 : i32
    return %c0_i32, %c0_i32_0 : i32, i32
  }
  func.func @transform_4(%arg0: i32, %arg1: i32) -> i32 {
    %c0_i32 = arith.constant 0 : i32
    %c0_i32_0 = arith.constant 0 : i32
    return %c0_i32 : i32
  }
  func.func @transform_5(%arg0: i32, %arg1: i32) -> (i32, i32) {
    %c0_i32 = arith.constant 0 : i32
    return %arg0, %arg1 : i32, i32
  }
}

</mosaic_0001>

<bundles_post_ra>
// kernel: tpu_custom_call.1
= control target key start
LH: loop header
LB: loop body
LE: loop exit
PB: predicated region body
PF: predicated region fallthrough
CT: control target
= control target key end

     0   :  { %vm60_vm0 = vcmask 64512   ;;  %v564_v2 = vmov 0.0   ;;  %vm565_vm1 = vmmov 0   ;;  %v566_v3 = vmov 0   ;;  %s701_s0 = inlined_call_operand.vmem [shape: f32[2,8,16], index: 0, kind: input, shape index: {}]   ;;  %s702_s1 = inlined_call_operand.vmem [shape: f32[33,8], index: 1, kind: input, shape index: {}]   ;;  %s703_s2 = inlined_call_operand.vmem [shape: f32[33,1], index: 2, kind: input, shape index: {}]   ;;  %s704_s3 = inlined_call_operand.vmem [shape: f32[1,32], index: 3, kind: input, shape index: {}]   ;;  %s705_s4 = inlined_call_operand.<no memory space> [shape: f32[1], index: 4, kind: input, shape index: {}]   ;;  %s706_s5 = inlined_call_operand.hbm [shape: f32[2,16], index: 5, kind: output, shape index: {}]  }
   0x1   :  { %v34_v0 = vld [vmem:[%s701_s0] sm:$0xff]  ;;  %465 = vmatprep.subr.mxu0 %v564_v2  ;;  %467 = vmatprep.mubr.msk.f32.mxu0 %vm565_vm1, %v564_v2  ;;  %v29_v5 = vld [vmem:[%s703_s2 + $0x10] sm:$0xff] }
   0x2   :  { %v605_v1 = vld [vmem:[%s702_s1] sm:$0xff]  ;;  %466 = vmatpush3.msra.mxu0 %v34_v0  ;;  %538 = vset.pattern.permute.xlu0 %v566_v3 }
   0x3   :  { %v27_v4 = vld [vmem:[%s703_s2] sm:$0xff]  ;;  %468 = vmatmul.mubr.msk.f32.vlgmr.msra.gmra.mrb[0].mxu0 %vm60_vm0, %v605_v1 }
   0x4   :  { %37 = vperm.xlu0 %538, %v27_v4  }
   0x5   :  { %11 = vsyncpa [#allocation4], 0  ;;  %470 = vmatprep.mubr.msk.f32.mxu0 %vm565_vm1, %v564_v2  ;;  %v23_v6 = vld [vmem:[%s702_s1 + $0x8] sm:$0xff]  ;;  %539 = vset.pattern.permute.xlu1 %v566_v3  ;;  %v30_v8 = vld [vmem:[%s703_s2 + $0x18] sm:$0xff]  ;;  %v567_v13 = vmov 0.0|0.0   ;;  %vm170_vm2 = vcmask 261120   ;;  %v244_v43 = vstv %s705_s4 }
   0x6   :  { %v28_v7 = vld [vmem:[%s703_s2 + $0x8] sm:$0xff]  ;;  %47 = vperm.xlu1 %539, %v29_v5   ;;  %490 = vmatprep.mubr.msk.f32.mxu1 %vm565_vm1, %v564_v2  ;;  %v24_v9 = vld [vmem:[%s702_s1 + $0x10] sm:$0xff]  ;;  %v31_v10 = vld [vmem:[%s703_s2 + $0x20] sm:$0x1]  ;;  %vm246_vm3 = vcmask 122880   ;;  %s568_s4 = smov [#allocation3]  }
   0x7   :  { %471 = vmatmul.mubr.msk.f32.gmra.mrb[2].mxu0 %vm60_vm0, %v23_v6  ;;  %v25_v11 = vld [vmem:[%s702_s1 + $0x18] sm:$0xff]  ;;  %v26_v12 = vld [vmem:[%s702_s1 + $0x20] sm:$0x1]  ;;  %521 = vmatprep.subr.bf16.mxu1 %v567_v13  ;;  %v436_v39 = vld [vmem:[%s701_s0 + $0x8] sm:$0xff]  ;;  %s422_s17 = sshll.u32 %s568_s4, 4  ;;  %s423_s17 = int_to_ptr.vmem [resolvable:$true] %s422_s17 }
   0x8   :  { %42 = vperm.xlu0 %538, %v28_v7   ;;  %473 = vmatprep.mubr.msk.f32.mxu0 %vm565_vm1, %v564_v2  ;;  %v32_v38 = vld [vmem:[%s704_s3] sm:$0x1]  ;;  %s540_s18 = scalar_lea.vmem %s423_s17, 32  ;;  %p545_p1 = scmp.lt.s32.totalorder %s423_s17, %s423_s17 }
   0x9   :  { %527 = vmatprep.subr.bf16.mxu0 %v567_v13  ;;  %p541_p0 = scmp.ne.s32.totalorder %s423_s17, %s540_s18  ;;  %p546_p2 = scmp.lt.s32.totalorder %s540_s18, %s540_s18 }
   0xa   :  { %52 = vperm.xlu1 %539, %v30_v8  }
   0xb   :  { %474 = vmatmul.mubr.msk.f32.gmra.mrb[4].mxu0 %vm60_vm0, %v24_v9  ;;  %p547_p3 = por %p546_p2, %p545_p1 }
   0xc   :  { %57 = vperm.xlu0 %538, %v31_v10   ;;  %476 = vmatprep.mubr.msk.f32.mxu0 %vm565_vm1, %v564_v2 }
   0xd   :  { %p548_p4 = pnand %p547_p3, %p541_p0 }
   0xf   :  { %477 = vmatmul.mubr.msk.f32.gmra.mrb[6].mxu0 %vm60_vm0, %v25_v11 }
  0x10   :  { %479 = vmatprep.mubr.msk.f32.mxu0 %vm565_vm1, %v564_v2 }
  0x13   :  { %480 = vmatmul.mubr.msk.f32.gmra.mrb[8].mxu0 %vm60_vm0, %v26_v12 }
  0x14   :  { %518 = vmatprep.mubr.msk.f32.mxu0 %vm565_vm1, %v564_v2 }
  0x83   :  { %v38_v14 = vpop.permute.xlu0 %37 }
  0x85   :  { %v48_v22 = vpop.permute.xlu1 %47 }
  0x87   :  { %v43_v18 = vpop.permute.xlu0 %42 }
  0x89   :  { %v53_v29 = vpop.permute.xlu1 %52 }
  0x8b   :  { %v58_v40 = vpop.permute.xlu0 %57 }
  0xd6   :  { %v142_v15 = vpop.f32.mrb[0].mxu0 }
  0xd7   :  { %v469_v16 = vpop.f32.mrb[1].mxu0  ;;  %v143_v17 = vadd.f32 %v142_v15, %v38_v14 }
  0xd9   :  { %v166_v23 = vmax.f32 %v143_v17, 0.0 }
  0xda   :  { %v147_v19 = vpop.f32.mrb[2].mxu0 }
  0xdb   :  { %v148_v20 = vadd.f32 %v147_v19, %v43_v18  ;;  %v472_v21 = vpop.f32.mrb[3].mxu0 }
  0xdd   :  { %v167_v24 = vmax.f32 %v148_v20, 0.0 }
  0xde   :  { %v152_v25 = vpop.f32.mrb[4].mxu0 }
  0xdf   :  { %v475_v26 = vpop.f32.mrb[5].mxu0  ;;  %v522_v27 = vpack.c.bf16 %v167_v24, %v166_v23  ;;  %v153_v28 = vadd.f32 %v152_v25, %v48_v22 }
  0xe1   :  { %523 = vmatpush3.bf16.msra.mxu1 %v522_v27  ;;  %v168_v33 = vmax.f32 %v153_v28, 0.0 }
  0xe2   :  { %v157_v30 = vpop.f32.mrb[6].mxu0  ;;  %524 = vmatprep.subr.bf16.mxu1 %v567_v13 }
  0xe3   :  { %v158_v31 = vadd.f32 %v157_v30, %v53_v29  ;;  %v478_v32 = vpop.f32.mrb[7].mxu0 }
  0xe5   :  { %v169_v34 = vmax.f32 %v158_v31, 0.0 }
  0xe6   :  { %v162_v35 = vpop.f32.mrb[8].mxu0 }
  0xe7   :  { %v525_v36 = vpack.c.bf16 %v169_v34, %v168_v33  ;;  %v481_v37 = vpop.f32.mrb[9].mxu0  ;;  %v163_v41 = vadd.f32 %v162_v35, %v58_v40 }
  0xe9   :  { %526 = vmatpush3.bf16.msra.mxu1 %v525_v36 }
  0xea   :  { %493 = vmatprep.subr.mxu1 %v564_v2 }
  0xec   :  { %491 = vmatmul.mubr.msk.f32.vlgmr.msra.gmra.mrb[0].mxu1 %vm170_vm2, %v32_v38 }
  0xed   :  { %494 = vmatpush3.msra.mxu1 %v436_v39  ;;  %495 = vmatprep.mubr.msk.f32.mxu1 %vm565_vm1, %v564_v2 }
  0xf0   :  { %496 = vmatmul.mubr.msk.f32.vlgmr.msra.gmra.mrb[2].mxu1 %vm60_vm0, %v605_v1 }
  0xf1   :  { %498 = vmatprep.mubr.msk.f32.mxu1 %vm565_vm1, %v564_v2 }
  0xf4   :  { %499 = vmatmul.mubr.msk.f32.gmra.mrb[4].mxu1 %vm60_vm0, %v23_v6 }
  0xf5   :  { %501 = vmatprep.mubr.msk.f32.mxu1 %vm565_vm1, %v564_v2 }
  0xf8   :  { %502 = vmatmul.mubr.msk.f32.gmra.mrb[6].mxu1 %vm60_vm0, %v24_v9 }
  0xf9   :  { %504 = vmatprep.mubr.msk.f32.mxu1 %vm565_vm1, %v564_v2 }
  0xfc   :  { %505 = vmatmul.mubr.msk.f32.gmra.mrb[8].mxu1 %vm60_vm0, %v25_v11 }
  0xfd   :  { %507 = vmatprep.mubr.msk.f32.mxu1 %vm565_vm1, %v564_v2 }
 0x100   :  { %508 = vmatmul.mubr.msk.f32.gmra.mrb[10].mxu1 %vm60_vm0, %v26_v12 }
 0x1bf   :  { %v240_v42 = vpop.f32.mrb[0].mxu1 }
 0x1c0   :  { %v241_v44 = vadd.f32 %v240_v42, %v163_v41  ;;  %v492_v45 = vpop.f32.mrb[1].mxu1 }
 0x1c2   :  { %v245_v46 = vadd.f32 %v244_v43, %v241_v44 }
 0x1c3   :  { %v316_v47 = vpop.f32.mrb[2].mxu1 }
 0x1c4   :  { %v497_v48 = vpop.f32.mrb[3].mxu1  ;;  %247 = vst.msk [vmem:[#allocation3] sm:$0x1] %vm246_vm3, %v245_v46  ;;  %v317_v49 = vadd.f32 %v316_v47, %v38_v14 }
 0x1c6   :  { %v340_v53 = vmax.f32 %v317_v49, 0.0 }
 0x1c7   :  { %v321_v50 = vpop.f32.mrb[4].mxu1 }
 0x1c8   :  { %v322_v51 = vadd.f32 %v321_v50, %v43_v18  ;;  %v500_v52 = vpop.f32.mrb[5].mxu1 }
 0x1ca   :  { %v341_v54 = vmax.f32 %v322_v51, 0.0 }
 0x1cb   :  { %v326_v55 = vpop.f32.mrb[6].mxu1 }
 0x1cc   :  { %v528_v56 = vpack.c.bf16 %v341_v54, %v340_v53  ;;  %v503_v57 = vpop.f32.mrb[7].mxu1  ;;  %v327_v58 = vadd.f32 %v326_v55, %v48_v22 }
 0x1ce   :  { %529 = vmatpush3.bf16.msra.mxu0 %v528_v56  ;;  %v342_v62 = vmax.f32 %v327_v58, 0.0 }
 0x1cf   :  { %v331_v59 = vpop.f32.mrb[8].mxu1  ;;  %530 = vmatprep.subr.bf16.mxu0 %v567_v13 }
 0x1d0   :  { %v332_v60 = vadd.f32 %v331_v59, %v53_v29  ;;  %v506_v61 = vpop.f32.mrb[9].mxu1 }
 0x1d2   :  { %v343_v63 = vmax.f32 %v332_v60, 0.0 }
 0x1d3   :  { %v336_v0 = vpop.f32.mrb[10].mxu1 }
 0x1d4   :  { %v531_v1 = vpack.c.bf16 %v343_v63, %v342_v62  ;;  %v509_v2 = vpop.f32.mrb[11].mxu1  ;;  %v337_v3 = vadd.f32 %v336_v0, %v58_v40 }
 0x1d6   :  { %532 = vmatpush3.bf16.msra.mxu0 %v531_v1 }
 0x1d9   :  { %519 = vmatmul.mubr.msk.f32.vlgmr.msra.gmra.mrb[10].mxu0 %vm170_vm2, %v32_v38 }
 0x2ac   :  { %v410_v4 = vpop.f32.mrb[10].mxu0 }
 0x2ad   :  { %v411_v5 = vadd.f32 %v410_v4, %v337_v3  ;;  %v520_v6 = vpop.f32.mrb[11].mxu0 }
 0x2af   :  { %v414_v7 = vadd.f32 %v411_v5, %v244_v43 }
 0x2b1   :  { %415 = vst.msk [vmem:[#allocation3 + $0x1] sm:$0x1] %vm246_vm3, %v414_v7 }
 0x2b2   :  { %551 = shalt.err (!%p548_p4)
}
 0x2b3   :  { %s552_s21 = scalar_lea.hbm %s706_s5, 32 }
 0x2b4   :  { %p553_p5 = scmp.ne.s32.totalorder %s706_s5, %s552_s21  ;;  %p556_p6 = scmp.lt.u32.totalorder %s552_s21, %s706_s5 }
 0x2b6   :  { %p558_p7 = pnand %p556_p6, %p553_p5 }
 0x2b8   :  { %561 = shalt.err (!%p558_p7)
}
 0x2b9   :  { %425 = dma.vmem_to_hbm [thread:$0]  %s423_s17, 32, %s706_s5, [#allocation4]  }
 0x2ba   :  { %562 = dma.done.wait [#allocation4], 32  }
 0x2bb   :  { %563 = vsyncadd [#allocation4], 4294967264 }
 0x2bc   :  { %429 = vsyncpa [#allocation4], 1 }

</bundles_post_ra>
